<compile_context>
chip_gen: v5e
topology: v5e:2x2
jax: 0.10.0
libtpu: 0.0.40
codegen_flags: <defaults>
</compile_context>

<pallas_src>
import math

import numpy as np

import jax
import jax.numpy as jnp
from jax.experimental import pallas as pl
from jax.experimental.pallas import tpu as pltpu


def encoder_kernel(k_start_ref, k_count_ref,                 # scalar prefetch (SMEM)
                   adj_ref, xw_ref, dinv_ref, pool_ref, b1_ref,
                   out_ref,                                   # per-row-tile partial pooled
                   h_acc_ref):                                # VMEM scratch [tile_n, H_pad]
    t = pl.program_id(0)          # row tile of the structure        ("parallel")
    k = pl.program_id(1)          # column block inside t's window   ("arbitrary")

    @pl.when(k == 0)
    def _init():
        h_acc_ref[...] = jnp.zeros_like(h_acc_ref)

    # Accumulate only over the column blocks that can be non-zero for this row tile
    # (block-diagonal A+I).  Skipped steps re-use the previous (clamped) block index,
    # so no DMA is issued for them; this pl.when only skips the MXU work.
    @pl.when(k < k_count_ref[t])
    def _accum():
        a = adj_ref[...].astype(jnp.bfloat16)    # 0/1 structure: exact in bf16
        h_acc_ref[...] += jnp.dot(a, xw_ref[...],
                                  preferred_element_type=jnp.float32)

    @pl.when(k == pl.num_programs(1) - 1)
    def _pool():
        # h_t = relu(D^-1/2 (A+I) (D^-1/2 X W1) + b1)  (row normalization in f32 here)
        h = jnp.maximum(dinv_ref[...] * h_acc_ref[...] + b1_ref[...], 0.0)
        # partial mean-pool for this row tile: out[t] = P[:, rows_t] @ h_t
        out_ref[...] = jnp.dot(pool_ref[...], h,
                               preferred_element_type=jnp.float32)[None]


def _round_up(v, m):
    return ((v + m - 1) // m) * m


def graph_encoder_gcn_forward(x, edge_index, batch, num_graphs,
                              w1, b1, w_lin1_t, b_lin1,
                              *, tile_n=256, tile_k=256):
    """x: [N, Fin], edge_index: [2, E] (no duplicate edges / explicit self loops),
       batch: [N] graph id per node (sorted, PyG convention),
       w1: [Fin, H], b1: [1, H], w_lin1_t: [H, Fout] (= linear1.weight.T), b_lin1: [1, Fout].
       Returns relu(linear1(global_mean_pool(relu(GCNConv(x)), batch))): [num_graphs, Fout].
       Note: the per-row-tile column windows are computed host-side (wrapper is not jitted
       over `batch`)."""
    N, Fin = x.shape
    H = w1.shape[1]
    B = num_graphs

    LANE, SUB = 128, 8
    f32 = jnp.float32
    pad_unit = math.lcm(tile_n, tile_k)
    N_pad = _round_up(N, pad_unit)
    H_pad = _round_up(H, LANE)
    B_pad = _round_up(B, SUB)

    src, dst = edge_index[0], edge_index[1]

    # ----- Factored symmetric normalization -----------------------------------------
    # Structure S = A + I built directly as padded int8 (no O(N^2) f32 intermediate).
    S = jnp.zeros((N_pad, N_pad), jnp.int8)
    S = S.at[dst, src].set(jnp.int8(1))                        # message flows src -> dst
    S = S.at[jnp.arange(N), jnp.arange(N)].set(jnp.int8(1))    # self loops (real nodes)
    deg = jnp.zeros((N,), f32).at[dst].add(1.0) + 1.0          # assumes no dup edges
    dinv = 1.0 / jnp.sqrt(deg)                                 # D^-1/2, exact f32

    # ----- XW hoisted out of the kernel: XW_scaled = D^-1/2 (x @ W1), stored bf16 ----
    xw = (x @ w1) * dinv[:, None]
    xw_p = jnp.zeros((N_pad, H_pad), jnp.bfloat16).at[:N, :H].set(xw.astype(jnp.bfloat16))

    dinv_p = jnp.zeros((N_pad, 1), f32).at[:N, 0].set(dinv)    # row factor, streamed f32
    b1_p = jnp.zeros((1, H_pad), f32).at[:, :H].set(b1)

    # Mean-pool matrix, built directly padded; zero columns for padded nodes keep the
    # relu(b1) rows of padded nodes out of the result (keep this invariant).
    batch_i32 = batch.astype(jnp.int32)
    batch_pad = jnp.full((N_pad,), -1, jnp.int32).at[:N].set(batch_i32)
    onehot = (batch_pad[None, :] == jnp.arange(B_pad, dtype=jnp.int32)[:, None]).astype(f32)
    pool_p = onehot / jnp.maximum(onehot.sum(axis=1, keepdims=True), 1.0)

    # ----- Block-diagonal column window per row tile (scalar prefetch) ---------------
    batch_np = np.asarray(batch_i32)
    assert np.all(np.diff(batch_np) >= 0), "batch must be sorted (PyG convention)"
    counts = np.bincount(batch_np, minlength=B)
    offsets = np.concatenate([[0], np.cumsum(counts)]).astype(np.int64)
    n_row_tiles = N_pad // tile_n
    n_col_blocks = N_pad // tile_k
    k_start = np.zeros((n_row_tiles,), np.int32)
    k_count = np.ones((n_row_tiles,), np.int32)
    for t in range(n_row_tiles):
        r0, r1 = t * tile_n, min((t + 1) * tile_n, N)
        if r0 >= N:
            continue                      # all-padding tile: 1 dummy block, pool zeroes it
        g_first = int(np.searchsorted(offsets, r0, side="right")) - 1
        g_last = int(np.searchsorted(offsets, r1 - 1, side="right")) - 1
        c0, c1 = int(offsets[g_first]), int(offsets[g_last + 1])
        k_start[t] = c0 // tile_k
        k_count[t] = min(-(-c1 // tile_k), n_col_blocks) - k_start[t]
    max_k = int(k_count.max())
    k_start = jnp.asarray(k_start)
    k_count = jnp.asarray(k_count)

    # Skipped steps (k >= k_count[t]) clamp to the last valid block -> the block index
    # equals the previous step's index -> Pallas issues no DMA for them.
    def adj_map(t, k, ks, kc):
        return (t, ks[t] + jnp.minimum(k, kc[t] - 1))

    def xw_map(t, k, ks, kc):
        return (ks[t] + jnp.minimum(k, kc[t] - 1), 0)

    # VMEM budget (K-tiled -> independent of N), generous headroom, explicit limit.
    est = (2 * tile_n * tile_k              # adj int8 (double buffered)
           + 2 * tile_k * H_pad * 2         # XW bf16
           + 2 * tile_n * 4                 # dinv
           + 2 * B_pad * tile_n * 4         # pool columns
           + 2 * H_pad * 4                  # b1
           + 2 * B_pad * H_pad * 4          # out block
           + tile_n * H_pad * 4)            # h accumulator scratch
    vmem_limit = int(min(max(4 * est, 32 * 1024 * 1024), 60 * 1024 * 1024))

    partial = pl.pallas_call(
        encoder_kernel,
        out_shape=jax.ShapeDtypeStruct((n_row_tiles, B_pad, H_pad), f32),
        grid_spec=pltpu.PrefetchScalarGridSpec(
            num_scalar_prefetch=2,
            grid=(n_row_tiles, max_k),
            in_specs=[
                pl.BlockSpec((tile_n, tile_k), adj_map),                      # int8 S tile
                pl.BlockSpec((tile_k, H_pad), xw_map),                        # bf16 XW tile
                pl.BlockSpec((tile_n, 1), lambda t, k, ks, kc: (t, 0)),       # dinv rows
                pl.BlockSpec((B_pad, tile_n), lambda t, k, ks, kc: (0, t)),   # pool cols
                pl.BlockSpec((1, H_pad), lambda t, k, ks, kc: (0, 0)),        # b1
            ],
            out_specs=pl.BlockSpec((1, B_pad, H_pad),
                                   lambda t, k, ks, kc: (t, 0, 0)),           # lane-dense
            scratch_shapes=[pltpu.VMEM((tile_n, H_pad), jnp.float32)],
        ),
        compiler_params=pltpu.CompilerParams(
            # Row tiles are independent (each writes its own partial pooled block), so
            # they can be sharded across v7x's two TensorCores; K is the reduction.
            dimension_semantics=("parallel", "arbitrary"),
            vmem_limit_bytes=vmem_limit,
        ),
    )(k_start, k_count, S, xw_p, dinv_p, pool_p, b1_p)

    # Tiny XLA epilogue: sum partial pooled blocks, then linear1 + relu.
    pooled = jnp.sum(partial, axis=0)[:B, :H]                    # [B, H]
    e1 = jnp.maximum(pooled @ w_lin1_t + b_lin1, 0.0)            # relu(relu(x)) == relu(x)
    return e1


if __name__ == "__main__":
    # Small problem consistent with the module: in_feature=8, hidden_feature=32,
    # out_feature=16.  Three graphs of different sizes so that, with tile_n=tile_k=128,
    # the (3, 3) grid exercises init / accumulate / skipped-block / finalize paths.
    in_feature, hidden_feature, out_feature = 8, 32, 16
    sizes = [100, 100, 120]
    B = len(sizes)
    N = sum(sizes)

    key = jax.random.PRNGKey(0)
    k_x, k_w1, k_b1, k_wl, k_bl = jax.random.split(key, 5)

    x = jax.random.normal(k_x, (N, in_feature), jnp.float32)

    # Deterministic edges: a directed ring inside each graph (no dups, no self loops).
    src_l, dst_l, off = [], [], 0
    for s in sizes:
        idx = np.arange(s) + off
        src_l.append(idx)
        dst_l.append(np.roll(idx, -1))
        off += s
    edge_index = jnp.asarray(np.stack([np.concatenate(src_l), np.concatenate(dst_l)]),
                             dtype=jnp.int32)
    batch = jnp.asarray(np.concatenate([np.full(s, g) for g, s in enumerate(sizes)]),
                        dtype=jnp.int32)

    # Deterministic parameters (same shapes as the PyTorch module).
    w1 = jax.random.normal(k_w1, (in_feature, hidden_feature), jnp.float32) * 0.1
    b1 = jax.random.normal(k_b1, (1, hidden_feature), jnp.float32) * 0.1
    # nn.Linear(hidden, out): weight [out, hidden]; we pass W^T.
    w_lin1_t = (jax.random.normal(k_wl, (out_feature, hidden_feature), jnp.float32) * 0.1).T
    b_lin1 = jax.random.normal(k_bl, (1, out_feature), jnp.float32) * 0.1

    out = graph_encoder_gcn_forward(x, edge_index, batch, B,
                                    w1, b1, w_lin1_t, b_lin1,
                                    tile_n=128, tile_k=128)
    out = jax.block_until_ready(out)

    # Reference 1: exact f32 math of the PyTorch module.
    src_j, dst_j = edge_index[0], edge_index[1]
    A = jnp.zeros((N, N), jnp.float32).at[dst_j, src_j].set(1.0) + jnp.eye(N, dtype=jnp.float32)
    deg = A.sum(axis=1)
    dinv = 1.0 / jnp.sqrt(deg)
    h_f32 = jnp.maximum((dinv[:, None] * A * dinv[None, :]) @ (x @ w1) + b1, 0.0)
    onehot = (batch[None, :] == jnp.arange(B)[:, None]).astype(jnp.float32)
    pool = onehot / onehot.sum(axis=1, keepdims=True)
    ref_f32 = jnp.maximum(pool @ h_f32 @ w_lin1_t + b_lin1, 0.0)

    # Reference 2: mirrors the kernel's only low-precision step (bf16 scaled-XW operand);
    # the 0/1 structure and the D^-1/2 factors are exact in the kernel.
    xw_bf = ((x @ w1) * dinv[:, None]).astype(jnp.bfloat16).astype(jnp.float32)
    h_bf = jnp.maximum(dinv[:, None] * (A @ xw_bf) + b1, 0.0)
    ref_bf = jnp.maximum(pool @ h_bf @ w_lin1_t + b_lin1, 0.0)

    assert out.shape == (B, out_feature)
    assert jnp.allclose(out, ref_bf, atol=1e-2, rtol=1e-2), (
        f"max abs err vs mirrored ref {jnp.max(jnp.abs(out - ref_bf))}")
    assert jnp.allclose(out, ref_f32, atol=2e-2, rtol=2e-2), (
        f"max abs err vs f32 ref {jnp.max(jnp.abs(out - ref_f32))}")

    print("KERNEL_OK")
</pallas_src>

<mosaic_0001>
module attributes {stable_mosaic.version = 11 : i64} {
  func.func @encoder_kernel(%arg0: i32, %arg1: i32, %arg2: memref<3xi32, #tpu.memory_space<smem>>, %arg3: memref<3xi32, #tpu.memory_space<smem>>, %arg4: memref<128x128xi8, #tpu.memory_space<vmem>>, %arg5: memref<128x128xbf16, #tpu.memory_space<vmem>>, %arg6: memref<128x1xf32, #tpu.memory_space<vmem>>, %arg7: memref<8x128xf32, #tpu.memory_space<vmem>>, %arg8: memref<1x128xf32, #tpu.memory_space<vmem>>, %arg9: memref<1x8x128xf32, #tpu.memory_space<vmem>>, %arg10: memref<128x128xf32, #tpu.memory_space<vmem>>) attributes {dimension_semantics = [#tpu.dimension_semantics<parallel>, #tpu.dimension_semantics<arbitrary>], iteration_bounds = array<i64: 3, 3>, scalar_prefetch = 2 : i64, scratch_operands = 1 : i64, tpu.core_type = #tpu.core_type<tc>, window_params = [{transform_indices = @transform_0, window_bounds = array<i64: 128, 128>}, {transform_indices = @transform_1, window_bounds = array<i64: 128, 128>}, {transform_indices = @transform_2, window_bounds = array<i64: 128, 1>}, {transform_indices = @transform_3, window_bounds = array<i64: 8, 128>}, {pipeline_mode = #tpu.pipeline_mode<synchronous>, transform_indices = @transform_4, window_bounds = array<i64: 1, 128>}, {transform_indices = @transform_5, window_bounds = array<i64: 1, 8, 128>}]} {
    %c0_i32 = arith.constant 0 : i32
    %0 = arith.cmpi eq, %arg1, %c0_i32 : i32
    %1 = arith.extui %0 : i1 to i32
    %c0_i32_0 = arith.constant 0 : i32
    %2 = arith.cmpi ne, %1, %c0_i32_0 : i32
    scf.if %2 {
      %cst = arith.constant 0.000000e+00 : f32
      %11 = vector.broadcast %cst : f32 to vector<128x128xf32>
      %c0 = arith.constant 0 : index
      %c0_3 = arith.constant 0 : index
      %12 = vector.load %arg10[%c0, %c0_3] : memref<128x128xf32, #tpu.memory_space<vmem>>, vector<128x128xf32>
      tpu.vector_store %arg10[%c0, %c0_3], %11 {strides = array<i32>} : memref<128x128xf32, #tpu.memory_space<vmem>>, vector<128x128xf32>,
    } else {
    }
    %3 = arith.index_cast %arg0 : i32 to index
    %4 = memref.load %arg3[%3] : memref<3xi32, #tpu.memory_space<smem>>
    %5 = arith.cmpi slt, %arg1, %4 : i32
    %6 = arith.extui %5 : i1 to i32
    %c0_i32_1 = arith.constant 0 : i32
    %7 = arith.cmpi ne, %6, %c0_i32_1 : i32
    scf.if %7 {
      %c0 = arith.constant 0 : index
      %c0_3 = arith.constant 0 : index
      %11 = vector.load %arg4[%c0, %c0_3] : memref<128x128xi8, #tpu.memory_space<vmem>>, vector<128x128xi8>
      %12 = arith.sitofp %11 : vector<128x128xi8> to vector<128x128xbf16>
      %c0_4 = arith.constant 0 : index
      %c0_5 = arith.constant 0 : index
      %13 = vector.load %arg10[%c0_4, %c0_5] : memref<128x128xf32, #tpu.memory_space<vmem>>, vector<128x128xf32>
      %c0_6 = arith.constant 0 : index
      %c0_7 = arith.constant 0 : index
      %14 = vector.load %arg5[%c0_6, %c0_7] : memref<128x128xbf16, #tpu.memory_space<vmem>>, vector<128x128xbf16>
      %cst = arith.constant dense<0.000000e+00> : vector<128x128xf32>
      %15 = tpu.matmul %12, %14, %cst {dimension_numbers = #tpu.dot_dimension_numbers<[1], [0], [0], [1], [0, 0, 1, 1], [], []>} : vector<128x128xbf16>, vector<128x128xbf16>, vector<128x128xf32> -> vector<128x128xf32>
      %16 = arith.addf %13, %15 : vector<128x128xf32>
      %c0_8 = arith.constant 0 : index
      %c0_9 = arith.constant 0 : index
      %17 = vector.load %arg10[%c0_8, %c0_9] : memref<128x128xf32, #tpu.memory_space<vmem>>, vector<128x128xf32>
      tpu.vector_store %arg10[%c0_8, %c0_9], %16 {strides = array<i32>} : memref<128x128xf32, #tpu.memory_space<vmem>>, vector<128x128xf32>,
    } else {
    }
    %c2_i32 = arith.constant 2 : i32
    %8 = arith.cmpi eq, %arg1, %c2_i32 : i32
    %9 = arith.extui %8 : i1 to i32
    %c0_i32_2 = arith.constant 0 : i32
    %10 = arith.cmpi ne, %9, %c0_i32_2 : i32
    scf.if %10 {
      %c0 = arith.constant 0 : index
      %c0_3 = arith.constant 0 : index
      %11 = vector.load %arg6[%c0, %c0_3] : memref<128x1xf32, #tpu.memory_space<vmem>>, vector<128x1xf32>
      %c0_4 = arith.constant 0 : index
      %c0_5 = arith.constant 0 : index
      %12 = vector.load %arg10[%c0_4, %c0_5] : memref<128x128xf32, #tpu.memory_space<vmem>>, vector<128x128xf32>
      %13 = vector.broadcast %11 : vector<128x1xf32> to vector<128x128xf32>
      %14 = arith.mulf %13, %12 : vector<128x128xf32>
      %c0_6 = arith.constant 0 : index
      %c0_7 = arith.constant 0 : index
      %15 = vector.load %arg8[%c0_6, %c0_7] : memref<1x128xf32, #tpu.memory_space<vmem>>, vector<1x128xf32>
      %16 = vector.broadcast %15 : vector<1x128xf32> to vector<128x128xf32>
      %17 = arith.addf %14, %16 : vector<128x128xf32>
      %cst = arith.constant 0.000000e+00 : f32
      %18 = vector.broadcast %cst : f32 to vector<128x128xf32>
      %19 = arith.maximumf %17, %18 : vector<128x128xf32>
      %c0_8 = arith.constant 0 : index
      %c0_9 = arith.constant 0 : index
      %20 = vector.load %arg7[%c0_8, %c0_9] : memref<8x128xf32, #tpu.memory_space<vmem>>, vector<8x128xf32>
      %cst_10 = arith.constant dense<0.000000e+00> : vector<8x128xf32>
      %21 = tpu.matmul %20, %19, %cst_10 {dimension_numbers = #tpu.dot_dimension_numbers<[1], [0], [0], [1], [0, 0, 1, 1], [], []>} : vector<8x128xf32>, vector<128x128xf32>, vector<8x128xf32> -> vector<8x128xf32>
      %22 = vector.shape_cast %21 : vector<8x128xf32> to vector<1x8x128xf32>
      %c0_11 = arith.constant 0 : index
      %c0_12 = arith.constant 0 : index
      %c0_13 = arith.constant 0 : index
      %23 = vector.load %arg9[%c0_11, %c0_12, %c0_13] : memref<1x8x128xf32, #tpu.memory_space<vmem>>, vector<1x8x128xf32>
      tpu.vector_store %arg9[%c0_11, %c0_12, %c0_13], %22 {strides = array<i32>} : memref<1x8x128xf32, #tpu.memory_space<vmem>>, vector<1x8x128xf32>,
    } else {
    }
    return
  }
  func.func @transform_0(%arg0: i32, %arg1: i32, %arg2: memref<3xi32, #tpu.memory_space<smem>>, %arg3: memref<3xi32, #tpu.memory_space<smem>>) -> (i32, i32) {
    %0 = arith.index_cast %arg0 : i32 to index
    %1 = memref.load %arg2[%0] : memref<3xi32, #tpu.memory_space<smem>>
    %2 = arith.index_cast %arg0 : i32 to index
    %3 = memref.load %arg3[%2] : memref<3xi32, #tpu.memory_space<smem>>
    %c1_i32 = arith.constant 1 : i32
    %4 = arith.subi %3, %c1_i32 : i32
    %5 = arith.minsi %arg1, %4 : i32
    %6 = arith.addi %1, %5 : i32
    %c0_i32 = arith.constant 0 : i32
    return %arg0, %6 : i32, i32
  }
  func.func @transform_1(%arg0: i32, %arg1: i32, %arg2: memref<3xi32, #tpu.memory_space<smem>>, %arg3: memref<3xi32, #tpu.memory_space<smem>>) -> (i32, i32) {
    %0 = arith.index_cast %arg0 : i32 to index
    %1 = memref.load %arg2[%0] : memref<3xi32, #tpu.memory_space<smem>>
    %2 = arith.index_cast %arg0 : i32 to index
    %3 = memref.load %arg3[%2] : memref<3xi32, #tpu.memory_space<smem>>
    %c1_i32 = arith.constant 1 : i32
    %4 = arith.subi %3, %c1_i32 : i32
    %5 = arith.minsi %arg1, %4 : i32
    %6 = arith.addi %1, %5 : i32
    %c0_i32 = arith.constant 0 : i32
    %c0_i32_0 = arith.constant 0 : i32
    return %6, %c0_i32 : i32, i32
  }
  func.func @transform_2(%arg0: i32, %arg1: i32, %arg2: memref<3xi32, #tpu.memory_space<smem>>, %arg3: memref<3xi32, #tpu.memory_space<smem>>) -> (i32, i32) {
    %c0_i32 = arith.constant 0 : i32
    %c0_i32_0 = arith.constant 0 : i32
    return %arg0, %c0_i32 : i32, i32
  }
  func.func @transform_3(%arg0: i32, %arg1: i32, %arg2: memref<3xi32, #tpu.memory_space<smem>>, %arg3: memref<3xi32, #tpu.memory_space<smem>>) -> (i32, i32) {
    %c0_i32 = arith.constant 0 : i32
    %c0_i32_0 = arith.constant 0 : i32
    return %c0_i32, %arg0 : i32, i32
  }
  func.func @transform_4(%arg0: i32, %arg1: i32, %arg2: memref<3xi32, #tpu.memory_space<smem>>, %arg3: memref<3xi32, #tpu.memory_space<smem>>) -> (i32, i32) {
    %c0_i32 = arith.constant 0 : i32
    %c0_i32_0 = arith.constant 0 : i32
    %c0_i32_1 = arith.constant 0 : i32
    return %c0_i32, %c0_i32_0 : i32, i32
  }
  func.func @transform_5(%arg0: i32, %arg1: i32, %arg2: memref<3xi32, #tpu.memory_space<smem>>, %arg3: memref<3xi32, #tpu.memory_space<smem>>) -> (i32, i32, i32) {
    %c0_i32 = arith.constant 0 : i32
    %c0_i32_0 = arith.constant 0 : i32
    %c0_i32_1 = arith.constant 0 : i32
    return %arg0, %c0_i32, %c0_i32_0 : i32, i32, i32
  }
}

</mosaic_0001>

<bundles_post_ra>
// kernel: tpu_custom_call.1
= control target key start
LH: loop header
LB: loop body
LE: loop exit
PB: predicated region body
PF: predicated region fallthrough
CT: control target
= control target key end

     0   :  { %s1414_s30 = smov [#allocation4]   ;;  %s1415_s8 = smov [#allocation5]   ;;  %s1816_s0 = inlined_call_operand.vmem [shape: s32[3], index: 0, kind: input, shape index: {}]   ;;  %s1817_s2 = inlined_call_operand.vmem [shape: s8[384,384], index: 2, kind: input, shape index: {}]   ;;  %s1818_s3 = inlined_call_operand.hbm [shape: bf16[384,128], index: 3, kind: input, shape index: {}]   ;;  %s1819_s4 = inlined_call_operand.vmem [shape: f32[384,1], index: 4, kind: input, shape index: {}]   ;;  %s1820_s5 = inlined_call_operand.vmem [shape: f32[8,384], index: 5, kind: input, shape index: {}]   ;;  %s1821_s6 = inlined_call_operand.vmem [shape: f32[1,128], index: 6, kind: input, shape index: {}]   ;;  %s1822_s7 = inlined_call_operand.hbm [shape: f32[3,8,128], index: 7, kind: output, shape index: {}]   ;;  %s1823_s1 = inlined_call_operand.vmem [shape: s32[3], index: 1, kind: input, shape index: {}]  }
   0x1   :  { %1831 = sst [smem:[#allocation25_spill]] %s1817_s2  ;;  %s13_s26 = sshll.u32 %s1816_s0, 4  ;;  %s14_s26 = int_to_ptr.vmem [resolvable:$true] %s13_s26 }
   0x2   :  { %1832 = sst [smem:[#allocation26_spill]] %s1819_s4  ;;  %s18_s29 = sshll.u32 %s1823_s1, 4  ;;  %s19_s29 = int_to_ptr.vmem [resolvable:$true] %s18_s29 }
   0x3   :  { %1833 = sst [smem:[#allocation27_spill]] %s1820_s5 }
   0x4   :  { %1834 = sst [smem:[#allocation28_spill]] %s1821_s6 }
   0x5   :  { %1835 = sst [smem:[#allocation29_spill]] %s1822_s7 }
   0x6   :  { %16 = dma.vmem_to_smem %s14_s26, 16, %s1414_s30, [#allocation3] }
   0x7   :  { %21 = dma.vmem_to_smem %s19_s29, 16, %s1415_s8, [#allocation3] }
   0x8   :  { %1352 = dma.done.wait [#allocation3], 32 }
   0x9   :  { %1353 = vsyncadd [#allocation3], 4294967264 }
   0xa   :  { %24 = sfence }
   0xb   :  { %25 = vsyncpa [#allocation8], 0 }
   0xc   :  { %27 = vsyncpa [#allocation8 + $0x1], 0 }
   0xd   :  { %28 = vsyncpa [#allocation9], 0 }
   0xe   :  { %30 = vsyncpa [#allocation9 + $0x1], 0  ;;  %s1466_s9 = smov 0   ;;  %s1468_s0 = smov 0  }
   0xf   :  { %s1470_s10 = smov 0   ;;  %s1472_s1 = smov 0  }
  0x10   :  { %s1474_s11 = smov 0   ;;  %s1476_s12 = smov 0  }
  0x11   :  { %s1478_s13 = smov 0   ;;  %s1480_s14 = smov 0  }
  0x12   :  { %s1482_s15 = smov 0   ;;  %s1484_s16 = smov 0  }
  0x13   :  { %s1486_s17 = smov 0   ;;  %s1488_s18 = smov 0  }
  0x14   :  { %s1490_s19 = smov 0  }
  0x15 LB: > { %1836 = sst [smem:[#allocation16_spill]] %s1380_s11  ;;  %s45_s22 = sadd.s32 1, %s1404_s17  ;;  %s1412_s19 = sphi %s1490_s19, %s36_s19   ;;  %s1408_s18 = sphi %s1488_s18, %s1874_s18   ;;  %s1404_s17 = sphi %s1486_s17, %s1881_s17   ;;  %s1400_s16 = sphi %s1484_s16, %s1872_s16   ;;  %s1396_s15 = sphi %s1482_s15, %s1880_s15   ;;  %s1392_s14 = sphi %s1480_s14, %s1871_s14   ;;  %s1388_s13 = sphi %s1478_s13, %s1870_s13   ;;  %s1384_s12 = sphi %s1476_s12, %s1879_s12   ;;  %s1380_s11 = sphi %s1474_s11, %s1878_s11   ;;  %s1376_s1 = sphi %s1472_s1, %s1868_s1   ;;  %s1372_s10 = sphi %s1470_s10, %s1877_s10   ;;  %s1368_s0 = sphi %s1468_s0, %s1876_s0   ;;  %s1364_s9 = sphi %s1466_s9, %s1875_s9  }
  0x16   : > { %1837 = sst [smem:[#allocation17_spill]] %s1392_s14  ;;  %s48_s23 = sadd.s32 1, %s1408_s18 }
  0x17   : > { %1838 = sst [smem:[#allocation18_spill]] %s1396_s15  ;;  %p46_p0 = scmp.ge.s32.totalorder %s45_s22, 3 }
  0x18   : > { %1839 = sst [smem:[#allocation19_spill]] %s1400_s16  ;;  %p76_p1 = scmp.ne.s32.totalorder %s1392_s14, %s1388_s13 }
  0x19   : > { %1840 = sst [smem:[#allocation20_spill]] %s1408_s18  ;;  %s1883_s22 = smov (%p46_p0, %s45_s22), 0 }
  0x1a   : > { %s1536_s24 = sld [smem:[#allocation4 + %s1408_s18]]  ;;  %s1885_s23 = smov (!%p46_p0, %s48_s23), %s1408_s18 }
  0x1b   : > { %s53_s25 = sld [smem:[#allocation5 + %s1408_s18]]  ;;  %p77_p2 = scmp.eq.s32.totalorder %s1412_s19, 0 }
  0x1c   : > { %1841 = sst [smem:[#allocation21_spill]] %s1883_s22  ;;  %p50_p3 = scmp.ge.s32.totalorder %s1885_s23, 3 }
  0x1d   : > { %s1547_s27 = sld [smem:[#allocation4 + %s1408_s18]]  ;;  %p1551_p4 = por %p77_p2, %p76_p1 }
  0x1e   : > { %s93_s29 = sld [smem:[#allocation5 + %s1408_s18]]  ;;  %s1887_s23 = smov (%p50_p3, %s1885_s23), 0 }
  0x1f   : > { %1843 = sst [smem:[#allocation22_spill]] %s1887_s23  ;;  %s1564_s20 = ssub.s32 %s1408_s18, %s1887_s23 }
  0x20   : > { %s58_s21 = sld [smem:[#allocation4 + %s1887_s23]]  ;;  %p114_p7 = scmp.ne.s32.totalorder %s1384_s12, %s1380_s11 }
  0x21   : > { %s998_s30 = sadd.s32 4294967295, %s53_s25  ;;  %s59_s26 = sld [smem:[#allocation5 + %s1887_s23]] }
  0x22   : > { %p55_p5 = scmp.lt.s32.totalorder %s1404_s17, %s998_s30  ;;  %s98_s15 = sld [smem:[#allocation4 + %s1887_s23]] }
  0x23   : > { %s99_s25 = sld [smem:[#allocation5 + %s1887_s23]]  ;;  %p1576_p8 = por %p114_p7, %p77_p2 }
  0x24   : > { %s56_s7 = scalar_select %p55_p5, %s1404_s17, %s998_s30 }
  0x25   : > { %s1000_s6 = sadd.s32 4294967295, %s93_s29  ;;  %p120_p10 = scmp.ne.s32.totalorder %s1380_s11, %s1376_s1 }
  0x26   : > { %s57_s5 = sadd.s32 %s56_s7, %s1536_s24  ;;  %p95_p6 = scmp.lt.s32.totalorder %s1404_s17, %s1000_s6 }
  0x27   : > { %s999_s4 = sadd.s32 4294967295, %s59_s26  ;;  %s1845_s24 = sadd.s32 4294967295, %s1412_s19  }
  0x28   : > { %s96_s8 = scalar_select %p95_p6, %s1404_s17, %s1000_s6 }
  0x29   : > { %p61_p9 = scmp.lt.s32.totalorder %s1883_s22, %s999_s4  ;;  %p121_p11 = scmp.eq.s32.totalorder %s1845_s24, 0 }
  0x2a   : > { %s97_s7 = sadd.s32 %s96_s8, %s1547_s27  ;;  %s1001_s6 = sadd.s32 4294967295, %s99_s25 }
  0x2b   : > { %s62_s29 = scalar_select %p61_p9, %s1883_s22, %s999_s4 }
  0x2c   : > { %p1587_p12 = por %p121_p11, %p120_p10  ;;  %p101_p13 = scmp.lt.s32.totalorder %s1883_s22, %s1001_s6 }
  0x2d   : > { %s63_s30 = sadd.s32 %s62_s29, %s58_s21  ;;  %p204_p0 = scmp.eq.s32.totalorder %s1564_s20, 0 }
  0x2e   : > { %s65_s23 = ssub.s32 %s57_s5, %s63_s30  ;;  %s206_s27 = sadd.s32 1, %s1372_s10 }
  0x2f   : > { %s66_s1 = sor.u32 %s65_s23, %s1564_s20  ;;  %p216_p2 = scmp.ne.s32.totalorder %s1372_s10, %s1368_s0 }
  0x30   : > { %p67_p1 = scmp.eq.s32.totalorder %s66_s1, 0  ;;  %s1847_s8 = sadd.s32 1, %s1392_s14 }
  0x31   : > { %s102_s4 = scalar_select %p101_p13, %s1883_s22, %s1001_s6 }
  0x32   : > { %s1601_s25 = scalar_select %p67_p1, %s1392_s14, %s1847_s8  }
  0x33   : > { %s103_s24 = sadd.s32 %s102_s4, %s98_s15  ;;  %s1849_s11 = sadd.s32 4294967295, %s1412_s19  }
  0x34   : > { %1848 = sst [smem:[#allocation23_spill]] %s1601_s25  ;;  %p217_p3 = scmp.eq.s32.totalorder %s1849_s11, 8 }
  0x35   : > { %s104_s21 = ssub.s32 %s97_s7, %s103_s24  ;;  %p222_p5 = scmp.ne.s32.totalorder %s1368_s0, %s1364_s9 }
  0x36   : > { %p105_p6 = scmp.eq.s32.totalorder %s104_s21, 0  ;;  %p1607_p7 = por %p217_p3, %p216_p2 }
  0x37   : > { %s1614_s5 = scalar_select %p204_p0, %s1372_s10, %s206_s27  }
  0x38   : > { %s1851_s23 = sadd.s32 1, %s1384_s12  ;;  %s1853_s6 = sadd.s32 4294967294, %s1412_s19  }
  0x39   : > { %s1619_s30 = scalar_select %p105_p6, %s1384_s12, %s1851_s23  }
  0x3a   : > { %p223_p9 = scmp.eq.s32.totalorder %s1853_s6, 8  ;;  %p1003_p11 = scmp.ge.s32.totalorder %s1412_s19, 9 }
  0x3b   : > { %1852 = sst [smem:[#allocation24_spill]] %s1619_s30 }
  0x3c   : > { %p1623_p10 = por %p223_p9, %p222_p5  ;;  %242 = sbr.rel (%p1003_p11) target bundleno = 116 (0x74), region = 20 }
  0x41   : > { %245 = sbr.rel (!%p1551_p4) target bundleno = 85 (0x55), region = 24  ;;  %s251_s11 = sld [smem:[#allocation5 + %s1408_s18]] (%p1551_p4) }
  0x42   : > { %s250_s15 = sld [smem:[#allocation4 + %s1408_s18]] (%p1551_p4)  ;;  %s247_s7 = sand.u32 (%p1551_p4), 1, %s1392_s14  }
  0x43   : > { %s1092_s27 = smul.u32 (%p1551_p4), 12, %s1408_s18  ;;  %s1004_s8 = sshll.u32 (%p1551_p4), %s247_s7, 5 }
  0x44   : > { %s1855_s2 = sld [smem:[#allocation25_spill]] (%p1551_p4)  ;;  %s249_s25 = scalar_lea.vmem (%p1551_p4), [#allocation6], %s1004_s8 }
  0x47   : > { %s1005_s20 = sadd.s32 4294967295, %s251_s11 }
  0x48   : > { %p253_p13 = scmp.lt.s32.totalorder %s1404_s17, %s1005_s20 }
  0x4a   : > { %s254_s4 = scalar_select %p253_p13, %s1404_s17, %s1005_s20 }
  0x4c   : > { %s255_s24 = sadd.s32 %s254_s4, %s250_s15 }
  0x4d   : > { %s258_s21 = sadd.s32 %s1092_s27, %s255_s24 }
  0x4e   : > { %s1008_s23 = sshll.u32 %s258_s21, 3 }
  0x4f   : > { %s260_s22 = scalar_lea.vmem %s1855_s2, %s1008_s23 }
  0x50   : > { %v295_v0 = vld [vmem:[%s260_s22] sm:$0xff]  ;;  %v297_v1 = vld [vmem:[%s260_s22 + $0x18] sm:$0xff]  ;;  %v299_v2 = vld [vmem:[%s260_s22 + $0x30] sm:$0xff] }
  0x51   : > { %296 = vst [vmem:[%s249_s25] sm:$0xff] %v295_v0  ;;  %v301_v3 = vld [vmem:[%s260_s22 + $0x48] sm:$0xff] }
  0x52   : > { %298 = vst [vmem:[%s249_s25 + $0x8] sm:$0xff] %v297_v1 }
  0x53   : > { %300 = vst [vmem:[%s249_s25 + $0x10] sm:$0xff] %v299_v2 }
  0x54   : > { %302 = vst [vmem:[%s249_s25 + $0x18] sm:$0xff] %v301_v3 }
  0x55 PF: > { %s1094_s11 = scalar_select %p1576_p8, %s1408_s18, 0 }
  0x56   : > { %s1095_s15 = scalar_select %p1576_p8, [#allocation5], [#allocation12] }
  0x57   : > { %s1093_s20 = scalar_select %p1576_p8, [#allocation4], [#allocation11] }
  0x58   : > { %s315_s7 = sld [smem:[%s1095_s15 + %s1094_s11]]  ;;  %s309_s27 = sand.u32 1, %s1384_s12  }
  0x59   : > { %s314_s22 = sld [smem:[%s1093_s20 + %s1094_s11]]  ;;  %s1009_s4 = sshll.u32 %s309_s27, 6 }
  0x5a   : > { %s313_s24 = scalar_lea.vmem [#allocation7], %s1009_s4  ;;  %s310_s30 = scalar_lea.sflag [#allocation8], %s309_s27 }
  0x5b   : > { %s327_s21 = sshll.u32 %s313_s24, 4  ;;  %s328_s21 = int_to_ptr.vmem [resolvable:$true] %s327_s21 }
  0x5e   : > { %s1010_s8 = sadd.s32 4294967295, %s315_s7 }
  0x5f   : > { %p317_p4 = scmp.lt.s32.totalorder %s1404_s17, %s1010_s8 }
  0x61   : > { %s318_s25 = scalar_select %p317_p4, %s1404_s17, %s1010_s8 }
  0x63   : > { %s319_s23 = sadd.s32 %s318_s25, %s314_s22  ;;  %s1250_s22 = scalar_lea.hbm %s1818_s3, 192 }
  0x64   : > { %s1059_s6 = sshll.u32 %s319_s23, 6 }
  0x65   : > { %s324_s18 = scalar_lea.hbm %s1818_s3, %s1059_s6 }
  0x66   : > { %s325_s14 = sshll.u32 %s324_s18, 4  ;;  %s326_s14 = int_to_ptr.hbm [resolvable:$true] %s325_s14 }
  0x67   : > { %s1244_s15 = sshra.s32 %s326_s14, 4  ;;  %s1245_s15 = int_to_ptr.hbm [resolvable:$true] %s1244_s15 }
  0x68   : > { %s1246_s11 = scalar_lea.hbm %s1245_s15, 64  ;;  %p1251_p3 = scmp.lt.s32.totalorder %s1245_s15, %s1818_s3 }
  0x69   : > { %p1247_p0 = scmp.ne.s32.totalorder %s1245_s15, %s1246_s11  ;;  %p1252_p5 = scmp.lt.s32.totalorder %s1250_s22, %s1246_s11 }
  0x6b   : > { %p1248_p1 = pnand %p1247_p0, %p1576_p8  ;;  %p1253_p6 = por %p1252_p5, %p1251_p3 }
  0x6d   : > { %p1249_p2 = pneg %p1248_p1 }
  0x6f   : > { %p1254_p9 = pnand %p1253_p6, %p1249_p2 }
  0x71   : > { %1257 = shalt.err (!%p1254_p9)
}
  0x72   : > { %s1416_s2 = smov 64   ;;  %s1417_s18 = smov 4  }
  0x73   : > { %1097 = dma.hbm_to_vmem [thread:$0]  (%p1576_p8), %s326_s14, 1024, %s328_s21, %s310_s30, %s1416_s2, %s1416_s2, %s1417_s18  }
  0x74 PF: > { %p1013_p11 = scmp.ge.s32.totalorder %s1412_s19, 1  ;;  %p351_p13 = scmp.lt.s32.totalorder %s1412_s19, 10 }
  0x76   : > { %p352_p4 = pnand %p1013_p11, %p351_p13 }
  0x77   : > { %s1856_s27 = sld [smem:[#allocation16_spill]] (!%p352_p4)  ;;  %s358_s25 = sand.u32 (!%p352_p4), 1, %s1388_s13  }
  0x78   : > { %355 = sbr.rel (%p352_p4) target bundleno = 702 (0x2be), region = 74  ;;  %s1014_s23 = sshll.u32 (!%p352_p4), %s358_s25, 5 }
  0x79   : > { %s1666_s28 = scalar_lea.vmem (!%p352_p4), [#allocation6], %s1014_s23 }
  0x7d   : > { %s364_s24 = sand.u32 1, %s1856_s27  }
  0x7e   : > { %s1015_s6 = sshll.u32 %s364_s24, 6  ;;  %s365_s15 = scalar_lea.sflag [#allocation8], %s364_s24 }
  0x7f   : > { %s1668_s11 = scalar_lea.vmem [#allocation7], %s1015_s6 }
  0x80   : > { %1355 = dma.done.wait (%p1587_p12), %s365_s15, 1024  }
  0x81   : > { %1357 = vsyncadd (%p1587_p12), %s365_s15, 4294966272  ;;  %s1857_s14 = sld [smem:[#allocation19_spill]]  ;;  %s406_s16 = sand.u32 1, %s1368_s0  }
  0x82   : > { %s1678_s30 = sshll.u32 %s406_s16, 3  ;;  %s1858_s26 = sld [smem:[#allocation26_spill]] }
  0x83   : > { %s1859_s18 = sld [smem:[#allocation27_spill]]  ;;  %s408_s25 = scalar_lea.vmem [#allocation10], %s1678_s30 }
  0x84   : > { %s1860_s24 = sld [smem:[#allocation18_spill]] }
  0x87   : > { %s1017_s13 = sshll.u32 %s1857_s14, 4  ;;  %p429_p0 = scmp.lt.s32.totalorder %s1857_s14, 2 }
  0x88   : > { %p424_p8 = scmp.lt.s32.totalorder %s1017_s13, 47 }
  0x89   : > { %s1891_s14 = smov (!%p429_p0, %s1857_s14), 2 }
  0x8a   : > { %s1889_s13 = smov (!%p424_p8, %s1017_s13), 47  ;;  %s1019_s4 = sshll.u32 %s1891_s14, 3 }
  0x8b   : > { %s1018_s21 = sshll.u32 %s1889_s13, 3  ;;  %s1690_s27 = scalar_lea.vmem %s1859_s18, %s1019_s4 }
  0x8c   : > { %s1685_s22 = scalar_lea.vmem %s1858_s26, %s1018_s21  ;;  %p1020_p12 = scmp.ne.s32.totalorder %s1860_s24, 0 }
  0x8e   : > { %436 = sbr.rel (%p1020_p12) target bundleno = 164 (0xa4), region = 86 }
  0x93   : > { %v1418_v4 = vmov 0.0  }
  0x94   : > { %437 = vst [vmem:[#allocation2 + $0x30] sm:$0xff] %v1418_v4 }
  0x95   : > { %438 = vst [vmem:[#allocation2] sm:$0xff] %v1418_v4 }
  0x96   : > { %439 = vst [vmem:[#allocation2 + $0x58] sm:$0xff] %v1418_v4 }
  0x97   : > { %440 = vst [vmem:[#allocation2 + $0x18] sm:$0xff] %v1418_v4 }
  0x98   : > { %441 = vst [vmem:[#allocation2 + $0x50] sm:$0xff] %v1418_v4 }
  0x99   : > { %442 = vst [vmem:[#allocation2 + $0x68] sm:$0xff] %v1418_v4 }
  0x9a   : > { %443 = vst [vmem:[#allocation2 + $0x8] sm:$0xff] %v1418_v4 }
  0x9b   : > { %444 = vst [vmem:[#allocation2 + $0x48] sm:$0xff] %v1418_v4 }
  0x9c   : > { %445 = vst [vmem:[#allocation2 + $0x40] sm:$0xff] %v1418_v4 }
  0x9d   : > { %446 = vst [vmem:[#allocation2 + $0x20] sm:$0xff] %v1418_v4 }
  0x9e   : > { %447 = vst [vmem:[#allocation2 + $0x10] sm:$0xff] %v1418_v4 }
  0x9f   : > { %448 = vst [vmem:[#allocation2 + $0x38] sm:$0xff] %v1418_v4 }
  0xa0   : > { %449 = vst [vmem:[#allocation2 + $0x60] sm:$0xff] %v1418_v4 }
  0xa1   : > { %450 = vst [vmem:[#allocation2 + $0x70] sm:$0xff] %v1418_v4 }
  0xa2   : > { %451 = vst [vmem:[#allocation2 + $0x78] sm:$0xff] %v1418_v4 }
  0xa3   : > { %452 = vst [vmem:[#allocation2 + $0x28] sm:$0xff] %v1418_v4 }
  0xa4 PF: > { %s1861_s23 = sld [smem:[#allocation19_spill]] }
  0xa5   : > { %s1862_s15 = sld [smem:[#allocation18_spill]] }
  0xaa   : > { %s453_s6 = sld [smem:[#allocation5 + %s1861_s23]] }
  0xb0   : > { %p1021_p1 = scmp.ge.s32.totalorder %s1862_s15, %s453_s6 }
  0xb2   : > { %457 = sbr.rel (%p1021_p1) target bundleno = 376 (0x178), region = 90 }
  0xb7   : > { %v1067_v5 = vld [vmem:[%s1668_s11 + $0x38] sm:$0xff]  ;;  %v1066_v6 = vld [vmem:[%s1668_s11 + $0x30] sm:$0xff]  ;;  %v1065_v7 = vld [vmem:[%s1668_s11 + $0x28] sm:$0xff] }
  0xb8   : > { %582 = vmatpush.bf16.msra.mxu0 %v1067_v5  ;;  %1068 = vmatpush.bf16.msra.mxu1 %v1067_v5  ;;  %v1064_v8 = vld [vmem:[%s1668_s11 + $0x20] sm:$0xff]  ;;  %v1063_v9 = vld [vmem:[%s1668_s11 + $0x18] sm:$0xff]  ;;  %v1062_v10 = vld [vmem:[%s1668_s11 + $0x10] sm:$0xff] }
  0xb9   : > { %1069 = vmatpush.bf16.msra.mxu2 %v1067_v5  ;;  %1070 = vmatpush.bf16.msra.mxu3 %v1067_v5  ;;  %v458_v11 = vld [vmem:[%s1666_s28] sm:$0xff]  ;;  %v459_v12 = vld [vmem:[%s1666_s28 + $0x8] sm:$0xff]  ;;  %v460_v13 = vld [vmem:[%s1666_s28 + $0x10] sm:$0xff] }
  0xba   : > { %v461_v14 = vld [vmem:[%s1666_s28 + $0x18] sm:$0xff]  ;;  %v462_v15 = vunpack.c.0.s8 %v458_v11  ;;  %v463_v16 = vunpack.c.1.s8 %v458_v11  ;;  %v466_v17 = vunpack.c.0.s8 %v459_v12  ;;  %v467_v18 = vunpack.c.1.s8 %v459_v12  ;;  %v1061_v19 = vld [vmem:[%s1668_s11 + $0x8] sm:$0xff]  ;;  %v1060_v28 = vld [vmem:[%s1668_s11] sm:$0xff] }
  0xbb   : > { %v470_v20 = vunpack.c.0.s8 %v460_v13  ;;  %v471_v21 = vunpack.c.1.s8 %v460_v13  ;;  %v474_v22 = vunpack.c.0.s8 %v461_v14  ;;  %v475_v23 = vunpack.c.1.s8 %v461_v14  ;;  %v502_v57 = vld [vmem:[#allocation2 + $0x30] sm:$0xff]  ;;  %v510_v63 = vld [vmem:[#allocation2 + $0x40] sm:$0xff]  ;;  %v507_v2 = vld [vmem:[#allocation2 + $0x68] sm:$0xff] }
  0xbc   : > { %583 = vmatpush.bf16.msra.mxu0 %v1066_v6  ;;  %1071 = vmatpush.bf16.msra.mxu1 %v1066_v6  ;;  %v478_v24 = vcvt.s32.f32 %v462_v15  ;;  %v479_v25 = vcvt.s32.f32 %v463_v16  ;;  %v482_v26 = vcvt.s32.f32 %v466_v17  ;;  %v483_v27 = vcvt.s32.f32 %v467_v18  ;;  %v506_v58 = vld [vmem:[#allocation2 + $0x50] sm:$0xff]  ;;  %v514_v0 = vld [vmem:[#allocation2 + $0x60] sm:$0xff] }
  0xbd   : > { %1072 = vmatpush.bf16.msra.mxu2 %v1066_v6  ;;  %1073 = vmatpush.bf16.msra.mxu3 %v1066_v6  ;;  %v486_v29 = vcvt.s32.f32 %v470_v20  ;;  %v487_v30 = vcvt.s32.f32 %v471_v21  ;;  %v490_v31 = vcvt.s32.f32 %v474_v22  ;;  %v491_v32 = vcvt.s32.f32 %v475_v23  ;;  %v503_v1 = vld [vmem:[#allocation2] sm:$0xff]  ;;  %v512_v23 = vld [vmem:[#allocation2 + $0x10] sm:$0xff] }
  0xbe   : > { %v494_v33 = vpack.c.bf16 %v479_v25, %v478_v24  ;;  %v496_v34 = vpack.c.bf16 %v483_v27, %v482_v26  ;;  %v464_v37 = vunpack.c.2.s8 %v458_v11  ;;  %v465_v38 = vunpack.c.3.s8 %v458_v11  ;;  %v511_v11 = vld [vmem:[#allocation2 + $0x20] sm:$0xff]  ;;  %v516_v24 = vld [vmem:[#allocation2 + $0x78] sm:$0xff]  ;;  %v509_v26 = vld [vmem:[#allocation2 + $0x48] sm:$0xff] }
  0xbf   : > { %v498_v35 = vpack.c.bf16 %v487_v30, %v486_v29  ;;  %v500_v36 = vpack.c.bf16 %v491_v32, %v490_v31  ;;  %v468_v39 = vunpack.c.2.s8 %v459_v12  ;;  %v469_v40 = vunpack.c.3.s8 %v459_v12  ;;  %v515_v12 = vld [vmem:[#allocation2 + $0x70] sm:$0xff]  ;;  %v505_v25 = vld [vmem:[#allocation2 + $0x18] sm:$0xff] }
  0xc0   : > { %584 = vmatpush.bf16.msra.mxu0 %v1065_v7  ;;  %1074 = vmatpush.bf16.msra.mxu1 %v1065_v7  ;;  %v472_v41 = vunpack.c.2.s8 %v460_v13  ;;  %v473_v42 = vunpack.c.3.s8 %v460_v13  ;;  %v476_v43 = vunpack.c.2.s8 %v461_v14  ;;  %v477_v44 = vunpack.c.3.s8 %v461_v14  ;;  %v504_v13 = vld [vmem:[#allocation2 + $0x58] sm:$0xff]  ;;  %v508_v14 = vld [vmem:[#allocation2 + $0x8] sm:$0xff] }
  0xc1   : > { %1075 = vmatpush.bf16.msra.mxu2 %v1065_v7  ;;  %1076 = vmatpush.bf16.msra.mxu3 %v1065_v7  ;;  %v480_v45 = vcvt.s32.f32 %v464_v37  ;;  %v481_v46 = vcvt.s32.f32 %v465_v38  ;;  %v484_v47 = vcvt.s32.f32 %v468_v39  ;;  %v485_v48 = vcvt.s32.f32 %v469_v40 }
  0xc2   : > { %v488_v49 = vcvt.s32.f32 %v472_v41  ;;  %v489_v50 = vcvt.s32.f32 %v473_v42  ;;  %v492_v51 = vcvt.s32.f32 %v476_v43  ;;  %v493_v52 = vcvt.s32.f32 %v477_v44 }
  0xc3   : > { %v495_v53 = vpack.c.bf16 %v481_v46, %v480_v45  ;;  %v497_v54 = vpack.c.bf16 %v485_v48, %v484_v47 }
  0xc4   : > { %585 = vmatpush.bf16.msra.mxu0 %v1064_v8  ;;  %1077 = vmatpush.bf16.msra.mxu1 %v1064_v8  ;;  %v499_v55 = vpack.c.bf16 %v489_v50, %v488_v49  ;;  %v501_v56 = vpack.c.bf16 %v493_v52, %v492_v51 }
  0xc5   : > { %1078 = vmatpush.bf16.msra.mxu2 %v1064_v8  ;;  %1079 = vmatpush.bf16.msra.mxu3 %v1064_v8 }
  0xc8   : > { %586 = vmatpush.bf16.msra.mxu0 %v1063_v9  ;;  %1080 = vmatpush.bf16.msra.mxu1 %v1063_v9 }
  0xc9   : > { %1081 = vmatpush.bf16.msra.mxu2 %v1063_v9  ;;  %1082 = vmatpush.bf16.msra.mxu3 %v1063_v9 }
  0xcc   : > { %587 = vmatpush.bf16.msra.mxu0 %v1062_v10  ;;  %1083 = vmatpush.bf16.msra.mxu1 %v1062_v10 }
  0xcd   : > { %1084 = vmatpush.bf16.msra.mxu2 %v1062_v10  ;;  %1085 = vmatpush.bf16.msra.mxu3 %v1062_v10 }
  0xd0   : > { %588 = vmatpush.bf16.msra.mxu0 %v1061_v19  ;;  %1086 = vmatpush.bf16.msra.mxu1 %v1061_v19 }
  0xd1   : > { %1087 = vmatpush.bf16.msra.mxu2 %v1061_v19  ;;  %1088 = vmatpush.bf16.msra.mxu3 %v1061_v19 }
  0xd4   : > { %589 = vmatpush.bf16.msra.mxu0 %v1060_v28  ;;  %1089 = vmatpush.bf16.msra.mxu1 %v1060_v28 }
  0xd5   : > { %1090 = vmatpush.bf16.msra.mxu2 %v1060_v28  ;;  %1091 = vmatpush.bf16.msra.mxu3 %v1060_v28 }
  0xd7   : > { %590 = vmatmul.bf16.vlgmr.msra.gmra.mxu0 %v494_v33  ;;  %600 = vmatmul.bf16.vlgmr.msra.gmra.mxu1 %v496_v34 }
  0xd8   : > { %610 = vmatmul.bf16.vlgmr.msra.gmra.mxu2 %v498_v35  ;;  %620 = vmatmul.bf16.vlgmr.msra.gmra.mxu3 %v500_v36  ;;  %v513_v35 = vld [vmem:[#allocation2 + $0x38] sm:$0xff]  ;;  %v517_v36 = vld [vmem:[#allocation2 + $0x28] sm:$0xff] }
  0xe7   : > { %595 = vmatmul.bf16.gmra.mxu0 %v495_v53  ;;  %605 = vmatmul.bf16.gmra.mxu1 %v497_v54 }
  0xe8   : > { %615 = vmatmul.bf16.gmra.mxu2 %v499_v55  ;;  %625 = vmatmul.bf16.gmra.mxu3 %v501_v56 }
 0x154   : > { %v591_v59 = vpop.f32.mrf.mxu0  ;;  %v601_v60 = vpop.f32.mrf.mxu1 }
 0x155   : > { %v631_v61 = vadd.f32 %v591_v59, %v502_v57  ;;  %v635_v62 = vadd.f32 %v601_v60, %v506_v58 }
 0x157   : > { %647 = vst [vmem:[#allocation2 + $0x30] sm:$0xff] %v631_v61 }
 0x158   : > { %651 = vst [vmem:[#allocation2 + $0x50] sm:$0xff] %v635_v62 }
 0x15b   : > { %v611_v3 = vpop.f32.mrf.mxu2  ;;  %v621_v4 = vpop.f32.mrf.mxu3 }
 0x15c   : > { %v639_v5 = vadd.f32 %v611_v3, %v510_v63  ;;  %v643_v6 = vadd.f32 %v621_v4, %v514_v0  ;;  %v593_v7 = vpop.f32.mrf.mxu0  ;;  %v603_v8 = vpop.f32.mrf.mxu1 }
 0x15d   : > { %v632_v9 = vadd.f32 %v593_v7, %v503_v1  ;;  %v636_v10 = vadd.f32 %v603_v8, %v507_v2 }
 0x15e   : > { %655 = vst [vmem:[#allocation2 + $0x40] sm:$0xff] %v639_v5 }
 0x15f   : > { %659 = vst [vmem:[#allocation2 + $0x60] sm:$0xff] %v643_v6 }
 0x160   : > { %648 = vst [vmem:[#allocation2] sm:$0xff] %v632_v9 }
 0x161   : > { %652 = vst [vmem:[#allocation2 + $0x68] sm:$0xff] %v636_v10 }
 0x163   : > { %v613_v15 = vpop.f32.mrf.mxu2  ;;  %v623_v16 = vpop.f32.mrf.mxu3 }
 0x164   : > { %v640_v17 = vadd.f32 %v613_v15, %v511_v11  ;;  %v644_v18 = vadd.f32 %v623_v16, %v515_v12  ;;  %v596_v19 = vpop.f32.mrf.mxu0  ;;  %v606_v20 = vpop.f32.mrf.mxu1 }
 0x165   : > { %v633_v21 = vadd.f32 %v596_v19, %v504_v13  ;;  %v637_v22 = vadd.f32 %v606_v20, %v508_v14 }
 0x166   : > { %656 = vst [vmem:[#allocation2 + $0x20] sm:$0xff] %v640_v17 }
 0x167   : > { %660 = vst [vmem:[#allocation2 + $0x70] sm:$0xff] %v644_v18 }
 0x168   : > { %649 = vst [vmem:[#allocation2 + $0x58] sm:$0xff] %v633_v21 }
 0x169   : > { %653 = vst [vmem:[#allocation2 + $0x8] sm:$0xff] %v637_v22 }
 0x16b   : > { %v616_v27 = vpop.f32.mrf.mxu2  ;;  %v626_v28 = vpop.f32.mrf.mxu3 }
 0x16c   : > { %v641_v29 = vadd.f32 %v616_v27, %v512_v23  ;;  %v645_v30 = vadd.f32 %v626_v28, %v516_v24  ;;  %v598_v31 = vpop.f32.mrf.mxu0  ;;  %v608_v32 = vpop.f32.mrf.mxu1 }
 0x16d   : > { %v634_v33 = vadd.f32 %v598_v31, %v505_v25  ;;  %v638_v34 = vadd.f32 %v608_v32, %v509_v26 }
 0x16e   : > { %657 = vst [vmem:[#allocation2 + $0x10] sm:$0xff] %v641_v29 }
 0x16f   : > { %661 = vst [vmem:[#allocation2 + $0x78] sm:$0xff] %v645_v30 }
 0x170   : > { %650 = vst [vmem:[#allocation2 + $0x18] sm:$0xff] %v634_v33 }
 0x171   : > { %654 = vst [vmem:[#allocation2 + $0x48] sm:$0xff] %v638_v34 }
 0x173   : > { %v618_v37 = vpop.f32.mrf.mxu2  ;;  %v628_v38 = vpop.f32.mrf.mxu3 }
 0x174   : > { %v642_v39 = vadd.f32 %v618_v37, %v513_v35  ;;  %v646_v40 = vadd.f32 %v628_v38, %v517_v36 }
 0x176   : > { %658 = vst [vmem:[#allocation2 + $0x38] sm:$0xff] %v642_v39 }
 0x177   : > { %662 = vst [vmem:[#allocation2 + $0x28] sm:$0xff] %v646_v40 }
 0x178 PF: > { %s1863_s28 = sld [smem:[#allocation18_spill]] }
 0x17e   : > { %p1054_p2 = scmp.ne.s32.totalorder %s1863_s28, 2 }
 0x17f   : > { %s1864_s13 = sld [smem:[#allocation28_spill]] (!%p1054_p2) }
 0x180   : > { %666 = sbr.rel (%p1054_p2) target bundleno = 681 (0x2a9), region = 94 }
 0x185   : > { %v682_v41 = vld [vmem:[%s1685_s22 + $0x78] sm:$0xff]  ;;  %v680_v42 = vld [vmem:[%s1685_s22 + $0x68] sm:$0xff]  ;;  %v1419_v44 = vmov 0   ;;  %v679_v45 = vld [vmem:[%s1685_s22 + $0x60] sm:$0xff] }
 0x186   : > { %v678_v43 = vld [vmem:[%s1685_s22 + $0x58] sm:$0xff]  ;;  %1218 = vset.pattern.permute.xlu2 %v1419_v44  ;;  %1217 = vset.pattern.permute.xlu1 %v1419_v44  ;;  %v681_v46 = vld [vmem:[%s1685_s22 + $0x70] sm:$0xff]  ;;  %v675_v48 = vld [vmem:[%s1685_s22 + $0x40] sm:$0xff] }
 0x187   : > { %1216 = vset.pattern.permute.xlu0 %v1419_v44  ;;  %766 = vperm.xlu1 %1217, %v680_v42   ;;  %v677_v47 = vld [vmem:[%s1685_s22 + $0x50] sm:$0xff]  ;;  %v676_v49 = vld [vmem:[%s1685_s22 + $0x48] sm:$0xff]  ;;  %v674_v50 = vld [vmem:[%s1685_s22 + $0x38] sm:$0xff] }
 0x188   : > { %776 = vperm.xlu0 %1216, %v682_v41   ;;  %756 = vperm.xlu2 %1218, %v678_v43   ;;  %v672_v51 = vld [vmem:[%s1685_s22 + $0x28] sm:$0xff]  ;;  %v673_v52 = vld [vmem:[%s1685_s22 + $0x30] sm:$0xff]  ;;  %v671_v53 = vld [vmem:[%s1685_s22 + $0x20] sm:$0xff] }
 0x189   : > { %v669_v54 = vld [vmem:[%s1685_s22 + $0x10] sm:$0xff]  ;;  %v670_v55 = vld [vmem:[%s1685_s22 + $0x18] sm:$0xff]  ;;  %v668_v56 = vld [vmem:[%s1685_s22 + $0x8] sm:$0xff] }
 0x18a   : > { %v667_v57 = vld [vmem:[%s1685_s22] sm:$0xff]  ;;  %v698_v59 = vld [vmem:[#allocation2 + $0x28] sm:$0xff]  ;;  %v696_v2 = vld [vmem:[#allocation2 + $0x70] sm:$0xff] }
 0x18b   : > { %v1728_v61 = vld [vmem:[%s1864_s13] ss:$0 sm:$0xff]  ;;  %v697_v4 = vld [vmem:[#allocation2 + $0x78] sm:$0xff]  ;;  %v693_v12 = vld [vmem:[#allocation2 + $0x10] sm:$0xff] }
 0x18c   : > { %v695_v5 = vld [vmem:[#allocation2 + $0x60] sm:$0xff]  ;;  %v694_v8 = vld [vmem:[#allocation2 + $0x38] sm:$0xff]  ;;  %v690_v25 = vld [vmem:[#allocation2 + $0x48] sm:$0xff] }
 0x18d   : > { %v692_v20 = vld [vmem:[#allocation2 + $0x20] sm:$0xff]  ;;  %v688_v36 = vld [vmem:[#allocation2 + $0x68] sm:$0xff]  ;;  %v687_v38 = vld [vmem:[#allocation2 + $0x50] sm:$0xff] }
 0x18e   : > { %v691_v21 = vld [vmem:[#allocation2 + $0x40] sm:$0xff]  ;;  %v689_v39 = vld [vmem:[#allocation2 + $0x8] sm:$0xff] }
 0x18f   : > { %761 = vperm.xlu1 %1217, %v679_v45  }
 0x190   : > { %771 = vperm.xlu0 %1216, %v681_v46   ;;  %751 = vperm.xlu2 %1218, %v677_v47  }
 0x197   : > { %741 = vperm.xlu1 %1217, %v675_v48  }
 0x198   : > { %746 = vperm.xlu0 %1216, %v676_v49   ;;  %736 = vperm.xlu2 %1218, %v674_v50  }
 0x19f   : > { %726 = vperm.xlu1 %1217, %v672_v51  }
 0x1a0   : > { %731 = vperm.xlu0 %1216, %v673_v52   ;;  %721 = vperm.xlu2 %1218, %v671_v53   ;;  %v685_v52 = vld [vmem:[#allocation2 + $0x58] sm:$0xff] }
 0x1a7   : > { %711 = vperm.xlu1 %1217, %v669_v54   ;;  %v684_v54 = vld [vmem:[#allocation2] sm:$0xff] }
 0x1a8   : > { %716 = vperm.xlu0 %1216, %v670_v55   ;;  %706 = vperm.xlu2 %1218, %v668_v56   ;;  %v686_v56 = vld [vmem:[#allocation2 + $0x18] sm:$0xff] }
 0x1b0   : > { %701 = vperm.xlu0 %1216, %v667_v57  }
 0x1e2   : > { %v757_v58 = vpop.permute.xlu2 %756 }
 0x1e3   : > { %v790_v14 = vmul.f32 %v757_v58, %v694_v8 }
 0x1e5   : > { %v810_v24 = vadd.f32 %v1728_v61, %v790_v14 }
 0x1e7   : > { %v826_v32 = vmax.f32 %v810_v24, 0.0 }
 0x1ea   : > { %v752_v62 = vpop.permute.xlu2 %751 }
 0x1eb   : > { %v789_v17 = vmul.f32 %v752_v62, %v693_v12  ;;  %v831_v12 = vld [vmem:[%s1690_s27] sm:$0xff] }
 0x1ed   : > { %v809_v30 = vadd.f32 %v1728_v61, %v789_v17 }
 0x1ef   : > { %v825_v35 = vmax.f32 %v809_v30, 0.0 }
 0x1f2   : > { %v737_v13 = vpop.permute.xlu2 %736 }
 0x1f3   : > { %v786_v31 = vmul.f32 %v737_v13, %v690_v25 }
 0x1f5   : > { %v806_v42 = vadd.f32 %v1728_v61, %v786_v31 }
 0x1f7   : > { %v822_v48 = vmax.f32 %v806_v42, 0.0 }
 0x1f9   : > { %v767_v60 = vpop.permute.xlu1 %766 }
 0x1fa   : > { %v777_v63 = vpop.permute.xlu0 %776  ;;  %v792_v6 = vmul.f32 %v767_v60, %v696_v2  ;;  %v722_v34 = vpop.permute.xlu2 %721 }
 0x1fb   : > { %v794_v0 = vmul.f32 %v777_v63, %v698_v59  ;;  %v783_v45 = vmul.f32 %v722_v34, %v687_v38 }
 0x1fc   : > { %v812_v16 = vadd.f32 %v1728_v61, %v792_v6 }
 0x1fd   : > { %v814_v1 = vadd.f32 %v1728_v61, %v794_v0  ;;  %v803_v53 = vadd.f32 %v1728_v61, %v783_v45 }
 0x1fe   : > { %v828_v23 = vmax.f32 %v812_v16, 0.0 }
 0x1ff   : > { %v830_v3 = vmax.f32 %v814_v1, 0.0  ;;  %v819_v0 = vmax.f32 %v803_v53, 0.0 }
 0x201   : > { %832 = vmatpush.msra.mxu0 %v830_v3  ;;  %v762_v7 = vpop.permute.xlu1 %761 }
 0x202   : > { %v772_v9 = vpop.permute.xlu0 %771  ;;  %v791_v11 = vmul.f32 %v762_v7, %v695_v5  ;;  %v707_v55 = vpop.permute.xlu2 %706  ;;  %v683_v5 = vld [vmem:[#allocation2 + $0x30] sm:$0xff] }
 0x203   : > { %v793_v10 = vmul.f32 %v772_v9, %v697_v4  ;;  %v780_v62 = vmul.f32 %v707_v55, %v684_v54 }
 0x204   : > { %v811_v19 = vadd.f32 %v1728_v61, %v791_v11 }
 0x205   : > { %v813_v15 = vadd.f32 %v1728_v61, %v793_v10  ;;  %v800_v4 = vadd.f32 %v1728_v61, %v780_v62 }
 0x206   : > { %v827_v29 = vmax.f32 %v811_v19, 0.0 }
 0x207   : > { %v829_v18 = vmax.f32 %v813_v15, 0.0  ;;  %v816_v9 = vmax.f32 %v800_v4, 0.0 }
 0x209   : > { %833 = vmatpush.msra.mxu0 %v829_v18  ;;  %v742_v22 = vpop.permute.xlu1 %741 }
 0x20a   : > { %v747_v26 = vpop.permute.xlu0 %746  ;;  %v787_v28 = vmul.f32 %v742_v22, %v691_v21 }
 0x20b   : > { %v788_v27 = vmul.f32 %v747_v26, %v692_v20  ;;  %834 = vmatpush.msra.mxu0 %v828_v23 }
 0x20c   : > { %v807_v37 = vadd.f32 %v1728_v61, %v787_v28 }
 0x20d   : > { %835 = vmatpush.msra.mxu0 %v827_v29  ;;  %v808_v33 = vadd.f32 %v1728_v61, %v788_v27 }
 0x20e   : > { %v823_v47 = vmax.f32 %v807_v37, 0.0 }
 0x20f   : > { %836 = vmatpush.msra.mxu0 %v826_v32  ;;  %v824_v41 = vmax.f32 %v808_v33, 0.0 }
 0x211   : > { %837 = vmatpush.msra.mxu0 %v825_v35  ;;  %v727_v40 = vpop.permute.xlu1 %726 }
 0x212   : > { %v732_v43 = vpop.permute.xlu0 %731  ;;  %v784_v44 = vmul.f32 %v727_v40, %v688_v36 }
 0x213   : > { %v785_v46 = vmul.f32 %v732_v43, %v689_v39  ;;  %838 = vmatpush.msra.mxu0 %v824_v41 }
 0x214   : > { %v804_v50 = vadd.f32 %v1728_v61, %v784_v44 }
 0x215   : > { %839 = vmatpush.msra.mxu0 %v823_v47  ;;  %v805_v49 = vadd.f32 %v1728_v61, %v785_v46 }
 0x216   : > { %v820_v58 = vmax.f32 %v804_v50, 0.0 }
 0x217   : > { %840 = vmatpush.msra.mxu0 %v822_v48  ;;  %v821_v51 = vmax.f32 %v805_v49, 0.0 }
 0x219   : > { %841 = vmatpush.msra.mxu0 %v821_v51  ;;  %v712_v57 = vpop.permute.xlu1 %711 }
 0x21a   : > { %v717_v59 = vpop.permute.xlu0 %716  ;;  %v781_v60 = vmul.f32 %v712_v57, %v685_v52 }
 0x21b   : > { %v782_v63 = vmul.f32 %v717_v59, %v686_v56  ;;  %842 = vmatpush.msra.mxu0 %v820_v58 }
 0x21c   : > { %v801_v2 = vadd.f32 %v1728_v61, %v781_v60 }
 0x21d   : > { %843 = vmatpush.msra.mxu0 %v819_v0  ;;  %v802_v1 = vadd.f32 %v1728_v61, %v782_v63 }
 0x21e   : > { %v817_v6 = vmax.f32 %v801_v2, 0.0 }
 0x21f   : > { %v818_v3 = vmax.f32 %v802_v1, 0.0 }
 0x221   : > { %844 = vmatpush.msra.mxu0 %v818_v3 }
 0x222   : > { %v702_v7 = vpop.permute.xlu0 %701 }
 0x223   : > { %v779_v8 = vmul.f32 %v702_v7, %v683_v5  ;;  %845 = vmatpush.msra.mxu0 %v817_v6 }
 0x225   : > { %846 = vmatpush.msra.mxu0 %v816_v9  ;;  %v799_v10 = vadd.f32 %v1728_v61, %v779_v8 }
 0x227   : > { %v815_v11 = vmax.f32 %v799_v10, 0.0 }
 0x229   : > { %847 = vmatpush.msra.mxu0 %v815_v11 }
 0x22a   : > { %848 = vmatmul.f32.vlgmr.msra.gmra.mxu0 %v831_v12 }
 0x2a7   : > { %v849_v13 = vpop.f32.mrf.mxu0 }
 0x2a8   : > { %852 = vst [vmem:[%s408_s25] sm:$0xff] %v849_v13 }
 0x2a9 PF: > { %s1865_s21 = sld [smem:[#allocation19_spill]]  ;;  %s866_s8 = sshll.u32 %s408_s25, 4  ;;  %s867_s8 = int_to_ptr.vmem [resolvable:$true] %s866_s8 }
 0x2aa   : > { %s1866_s22 = sld [smem:[#allocation29_spill]]  ;;  %s854_s18 = scalar_lea.sflag [#allocation9], %s406_s16 }
 0x2af   : > { %s1056_s20 = sshll.u32 %s1865_s21, 3 }
 0x2b0   : > { %s864_s4 = scalar_lea.hbm %s1866_s22, %s1056_s20  ;;  %s1292_s15 = scalar_lea.hbm %s1866_s22, 24 }
 0x2b1   : > { %s868_s2 = sshll.u32 %s864_s4, 4  ;;  %s869_s2 = int_to_ptr.hbm [resolvable:$true] %s868_s2 }
 0x2b2   : > { %s1286_s27 = sshra.s32 %s869_s2, 4  ;;  %s1287_s27 = int_to_ptr.hbm [resolvable:$true] %s1286_s27 }
 0x2b3   : > { %s1288_s24 = scalar_lea.hbm %s1287_s27, 8  ;;  %p1293_p9 = scmp.lt.s32.totalorder %s1287_s27, %s1866_s22 }
 0x2b4   : > { %p1289_p3 = scmp.ne.s32.totalorder %s1287_s27, %s1288_s24  ;;  %p1294_p11 = scmp.lt.s32.totalorder %s1292_s15, %s1288_s24 }
 0x2b6   : > { %p1290_p5 = pnand %p1289_p3, %p1607_p7  ;;  %p1295_p13 = por %p1294_p11, %p1293_p9 }
 0x2b8   : > { %p1291_p6 = pneg %p1290_p5 }
 0x2ba   : > { %p1296_p4 = pnand %p1295_p13, %p1291_p6 }
 0x2bc   : > { %1299 = shalt.err (!%p1296_p4)
}
 0x2bd   : > { %1099 = dma.vmem_to_hbm [thread:$0]  (%p1607_p7), %s867_s8, 128, %s869_s2, %s854_s18  }
 0x2be PF: > { %p1105_p8 = scmp.ge.s32.totalorder %s1412_s19, 2  ;;  %s880_s16 = sand.u32 1, %s1364_s9  }
 0x2bf   : > { %s881_s30 = scalar_lea.sflag [#allocation9], %s880_s16 }
 0x2c0   : > { %p1102_p0 = pnand %p1105_p8, %p1623_p10 }
 0x2c2   : > { %p1103_p12 = pneg %p1102_p0 }
 0x2c4   : > { %1359 = dma.done.wait (%p1103_p12), %s881_s30, 128  }
 0x2c5   : > { %1361 = vsyncadd (%p1103_p12), %s881_s30, 4294967168  ;;  %s36_s19 = sadd.s32 1, %s1412_s19   ;;  %s1868_s1 = sld [smem:[#allocation16_spill]] }
 0x2c6   : > { %p1772_p1 = scmp.ge.s32.totalorder %s36_s19, 11   ;;  %s1869_s29 = sld [smem:[#allocation24_spill]] }
 0x2c7   : > { %s1870_s13 = sld [smem:[#allocation17_spill]]  ;;  %s1875_s9 = smov %s1368_s0 }
 0x2c8   : > { %s1871_s14 = sld [smem:[#allocation23_spill]]  ;;  %s1876_s0 = smov %s1372_s10 }
 0x2c9   : > { %s1872_s16 = sld [smem:[#allocation20_spill]]  ;;  %s1877_s10 = smov %s1614_s5 }
 0x2ca   : > { %s1873_s21 = sld [smem:[#allocation21_spill]]  ;;  %s1878_s11 = smov %s1384_s12 }
 0x2cb   : > { %s1874_s18 = sld [smem:[#allocation22_spill]]  ;;  %s1880_s15 = smov %s1404_s17 }
 0x2cc   : > { %s1879_s12 = smov %s1869_s29  ;;  %35 = sbr.rel (!%p1772_p1) target bundleno = 21 (0x15), region = 149 }
 0x2d0   : > { %s1881_s17 = smov %s1873_s21 }
 0x2d1   :  { %887 = vsyncpa [#allocation8], 1 }
 0x2d2   :  { %889 = vsyncpa [#allocation8 + $0x1], 1 }
 0x2d3   :  { %890 = vsyncpa [#allocation9], 1 }
 0x2d4   :  { %892 = vsyncpa [#allocation9 + $0x1], 1 }

</bundles_post_ra>
